<compile_context>
chip_gen: v7x
topology: tpu7x:2x2x1
jax: 0.10.0
libtpu: 0.0.40
codegen_flags: <defaults>
</compile_context>

<pallas_src>
import jax
import jax.numpy as jnp
from jax.experimental import pallas as pl
from jax.experimental.pallas import tpu as pltpu


def _round_up(x, m):
    return ((x + m - 1) // m) * m


def _round_down(x, m):
    return (x // m) * m


def _gating_kernel(x_ref, w_ref, b_ref, o_ref):
    # x_ref: (Nb, Cin, TILE_S)   channel-major input tile (spatial on lanes)
    # w_ref: (Cout, Cin)         1x1 conv weight with BN scale folded in
    # b_ref: (Cout, 1)           folded bias = (conv_b - mean) * scale + beta
    # o_ref: (Nb, Cout, TILE_S)  lane-dense output tile
    x = x_ref[...]
    w = w_ref[...]
    b = b_ref[...]
    nb, cin, _ = x.shape

    if cin >= 16:
        # MXU path for non-trivial channel counts: (Cout,Cin) x (Cin,TILE_S) contraction.
        for n in range(nb):  # nb is 1 in practice when Cin is large
            acc = jnp.dot(w, x[n], preferred_element_type=jnp.float32) + b
            o_ref[n] = jnp.maximum(acc, 0.0).astype(o_ref.dtype)
    else:
        # VPU broadcast-FMAs: acc[n, c, s] = b[c] + sum_k w[c, k] * x[n, k, s]
        acc = b[None, :, :] + w[None, :, 0:1] * x[:, 0:1, :]        # (Nb, Cout, TILE_S)
        for k in range(1, cin):                                      # static unroll
            acc = acc + w[None, :, k:k + 1] * x[:, k:k + 1, :]
        o_ref[...] = jnp.maximum(acc, 0.0).astype(o_ref.dtype)


def _tpu_vmem_budget():
    """(resident_budget_bytes, vmem_limit_bytes) per TPU generation."""
    kind = ""
    try:
        kind = jax.devices()[0].device_kind.lower()
    except Exception:
        pass
    if ("v5" in kind) or ("v6" in kind):
        # 128 MiB physical VMEM: raise the scoped limit and use big tiles.
        return 48 * 1024 * 1024, 64 * 1024 * 1024
    # v7x (64 MiB VMEM) or unknown: stay conservative.
    return 24 * 1024 * 1024, 32 * 1024 * 1024


def _choose_tiling(N, Cin, Cout, HW, in_dtype, out_dtype, budget_bytes, max_tile_s=None):
    in_isz = jnp.dtype(in_dtype).itemsize
    out_isz = jnp.dtype(out_dtype).itemsize
    in_pack = 8 * (4 // in_isz)      # sublane padding granularity (f32: 8, bf16: 16)
    out_pack = 8 * (4 // out_isz)
    # Double-buffered (input + output) resident VMEM bytes per (batch, spatial element),
    # accounting for sublane padding of the small channel dims.
    bytes_per_bs = 2 * (_round_up(Cin, in_pack) * in_isz
                        + _round_up(Cout, out_pack) * out_isz)

    hw_pad = _round_up(HW, 128)

    # Largest lane-dense spatial tile (one batch element) that fits the resident budget.
    tile_s = max(128, _round_down(budget_bytes // bytes_per_bs, 128))
    tile_s = min(tile_s, hw_pad)
    if max_tile_s is not None:
        tile_s = min(tile_s, max(128, _round_down(int(max_tile_s), 128)))  # cap rounds DOWN

    # Tiny spatial extent: fold multiple batch elements per step to amortize overhead.
    nb = 1
    if tile_s >= hw_pad:
        tile_s = hw_pad
        nb = int(min(N, max(1, budget_bytes // (tile_s * bytes_per_bs))))
        nb = min(nb, 32)

    # Megacore occupancy: prefer >= 4 total grid steps, but only if each step still
    # moves a few MiB (otherwise per-step overhead amortization matters more).
    batch_steps = -(-N // nb)
    spatial_steps = -(-HW // tile_s)
    if batch_steps * spatial_steps < 4 and HW > 128:
        want_spatial = -(-4 // batch_steps)
        cand = max(128, _round_up(-(-HW // want_spatial), 128))
        moved_per_step = nb * cand * (bytes_per_bs // 2)   # single-buffer bytes per step
        if moved_per_step >= 2 * 1024 * 1024:
            tile_s = min(tile_s, cand)

    return nb, tile_s


def unet_grid_gating_signal(x_nchw, conv_w, conv_b, bn_gamma, bn_beta,
                            bn_mean, bn_var, eps=1e-5, out_dtype=None, max_tile_s=None):
    """Conv2d(1x1, stride 1, pad 0) + BatchNorm2d (inference) + ReLU.

    x_nchw:  (N, Cin, H, W)
    conv_w:  (Cout, Cin, 1, 1)
    conv_b, bn_*: (Cout,)
    returns: (N, Cout, H, W) in `out_dtype` (defaults to x's dtype).
    """
    N, Cin, H, W = x_nchw.shape
    Cout = conv_w.shape[0]
    HW = H * W
    out_dtype = jnp.dtype(x_nchw.dtype) if out_dtype is None else jnp.dtype(out_dtype)

    # Free layout view: NCHW -> (N, Cin, H*W). No data movement.
    x3 = x_nchw.reshape(N, Cin, HW)

    # Fold BN into the conv: w_folded = w * scale, bias = (conv_b - mean)*scale + beta.
    scale = bn_gamma / jnp.sqrt(bn_var + eps)                                    # (Cout,)
    w_folded = (conv_w.reshape(Cout, Cin) * scale[:, None]).astype(jnp.float32)  # (Cout, Cin)
    bias = ((conv_b - bn_mean) * scale + bn_beta).reshape(Cout, 1).astype(jnp.float32)

    budget, vmem_limit = _tpu_vmem_budget()
    nb, tile_s = _choose_tiling(N, Cin, Cout, HW, x3.dtype, out_dtype, budget, max_tile_s)
    grid = (pl.cdiv(N, nb), pl.cdiv(HW, tile_s))

    out3 = pl.pallas_call(
        _gating_kernel,
        out_shape=jax.ShapeDtypeStruct((N, Cout, HW), out_dtype),
        grid_spec=pl.GridSpec(
            grid=grid,
            in_specs=[
                # x: (N, Cin, HW) -> kernel sees (nb, Cin, tile_s)
                pl.BlockSpec((nb, Cin, tile_s), lambda n, s: (n, 0, s)),
                # weight / bias: tiny constants, same block every step (no re-fetch).
                pl.BlockSpec((Cout, Cin), lambda n, s: (0, 0)),
                pl.BlockSpec((Cout, 1), lambda n, s: (0, 0)),
            ],
            out_specs=pl.BlockSpec((nb, Cout, tile_s), lambda n, s: (n, 0, s)),
        ),
        compiler_params=pltpu.CompilerParams(
            dimension_semantics=("parallel", "parallel"),
            vmem_limit_bytes=vmem_limit,
        ),
    )(x3, w_folded, bias)

    # Free reshape back to NCHW.
    return out3.reshape(N, Cout, H, W)


def _kaiming_conv_weight(key, cout, cin, kh=1, kw=1):
    # kaiming_normal_ (fan_in, a=0): std = sqrt(2 / fan_in)
    fan_in = cin * kh * kw
    std = (2.0 / fan_in) ** 0.5
    return jax.random.normal(key, (cout, cin, kh, kw), dtype=jnp.float32) * std


if __name__ == "__main__":
    key = jax.random.PRNGKey(0)
    k_x, k_w, k_b, k_g, k_be = jax.random.split(key, 5)

    # small shapes consistent with the module: batch=2, in=4, out=8, spatial=16
    N, Cin, Cout, H, W = 2, 4, 8, 16, 16

    x = jax.random.normal(k_x, (N, Cin, H, W), dtype=jnp.float32)

    conv_w = _kaiming_conv_weight(k_w, Cout, Cin)
    conv_b = jax.random.normal(k_b, (Cout,), dtype=jnp.float32) * 0.01
    bn_gamma = jnp.ones((Cout,), dtype=jnp.float32)
    bn_beta = jnp.zeros((Cout,), dtype=jnp.float32)
    bn_mean = jnp.zeros((Cout,), dtype=jnp.float32)   # inference-mode running stats
    bn_var = jnp.ones((Cout,), dtype=jnp.float32)

    # Pure-JAX reference of the same math (unfused order).
    ref = jnp.einsum("nchw,oc->nohw", x, conv_w.reshape(Cout, Cin))
    ref = ref + conv_b[None, :, None, None]
    scale = bn_gamma / jnp.sqrt(bn_var + 1e-5)
    ref = (ref - bn_mean[None, :, None, None]) * scale[None, :, None, None] \
          + bn_beta[None, :, None, None]
    ref = jnp.maximum(ref, 0.0)

    # f32 output path
    out = unet_grid_gating_signal(x, conv_w, conv_b, bn_gamma, bn_beta, bn_mean, bn_var)
    out = jax.block_until_ready(out)
    assert out.shape == (N, Cout, H, W)
    assert jnp.allclose(out, ref, atol=1e-5, rtol=1e-5)

    # bf16 output path (cuts write-heavy HBM traffic ~33% on the bandwidth-bound kernel)
    out_bf16 = unet_grid_gating_signal(x, conv_w, conv_b, bn_gamma, bn_beta, bn_mean, bn_var,
                                       out_dtype=jnp.bfloat16)
    out_bf16 = jax.block_until_ready(out_bf16)
    assert out_bf16.dtype == jnp.bfloat16
    assert jnp.allclose(out_bf16.astype(jnp.float32), ref, atol=3e-2, rtol=3e-2)

    print("KERNEL_OK")
</pallas_src>

<mosaic_0001>
module attributes {stable_mosaic.version = 11 : i64} {
  func.func @_gating_kernel(%arg0: i32, %arg1: i32, %arg2: memref<2x4x256xf32, #tpu.memory_space<vmem>>, %arg3: memref<8x4xf32, #tpu.memory_space<vmem>>, %arg4: memref<8x1xf32, #tpu.memory_space<vmem>>, %arg5: memref<2x8x256xf32, #tpu.memory_space<vmem>>) attributes {dimension_semantics = [#tpu.dimension_semantics<parallel>, #tpu.dimension_semantics<parallel>], iteration_bounds = array<i64: 1, 1>, scalar_prefetch = 0 : i64, scratch_operands = 0 : i64, tpu.core_type = #tpu.core_type<tc>, window_params = [{transform_indices = @transform_0, window_bounds = array<i64: 2, 4, 256>}, {pipeline_mode = #tpu.pipeline_mode<synchronous>, transform_indices = @transform_1, window_bounds = array<i64: 8, 4>}, {pipeline_mode = #tpu.pipeline_mode<synchronous>, transform_indices = @transform_2, window_bounds = array<i64: 8, 1>}, {transform_indices = @transform_3, window_bounds = array<i64: 2, 8, 256>}]} {
    %c0 = arith.constant 0 : index
    %c0_0 = arith.constant 0 : index
    %c0_1 = arith.constant 0 : index
    %0 = vector.load %arg2[%c0, %c0_0, %c0_1] : memref<2x4x256xf32, #tpu.memory_space<vmem>>, vector<2x4x256xf32>
    %c0_2 = arith.constant 0 : index
    %c0_3 = arith.constant 0 : index
    %1 = vector.load %arg3[%c0_2, %c0_3] : memref<8x4xf32, #tpu.memory_space<vmem>>, vector<8x4xf32>
    %c0_4 = arith.constant 0 : index
    %c0_5 = arith.constant 0 : index
    %2 = vector.load %arg4[%c0_4, %c0_5] : memref<8x1xf32, #tpu.memory_space<vmem>>, vector<8x1xf32>
    %3 = vector.shape_cast %2 : vector<8x1xf32> to vector<1x8x1xf32>
    %4 = vector.extract_strided_slice %1 {offsets = [0, 0], sizes = [8, 1], strides = [1, 1]} : vector<8x4xf32> to vector<8x1xf32>
    %5 = vector.shape_cast %4 : vector<8x1xf32> to vector<1x8x1xf32>
    %6 = vector.extract_strided_slice %0 {offsets = [0, 0, 0], sizes = [2, 1, 256], strides = [1, 1, 1]} : vector<2x4x256xf32> to vector<2x1x256xf32>
    %7 = vector.broadcast %5 : vector<1x8x1xf32> to vector<2x8x256xf32>
    %8 = vector.broadcast %6 : vector<2x1x256xf32> to vector<2x8x256xf32>
    %9 = arith.mulf %7, %8 : vector<2x8x256xf32>
    %10 = vector.broadcast %3 : vector<1x8x1xf32> to vector<2x8x256xf32>
    %11 = arith.addf %10, %9 : vector<2x8x256xf32>
    %12 = vector.extract_strided_slice %1 {offsets = [0, 1], sizes = [8, 1], strides = [1, 1]} : vector<8x4xf32> to vector<8x1xf32>
    %13 = vector.shape_cast %12 : vector<8x1xf32> to vector<1x8x1xf32>
    %14 = vector.extract_strided_slice %0 {offsets = [0, 1, 0], sizes = [2, 1, 256], strides = [1, 1, 1]} : vector<2x4x256xf32> to vector<2x1x256xf32>
    %15 = vector.broadcast %13 : vector<1x8x1xf32> to vector<2x8x256xf32>
    %16 = vector.broadcast %14 : vector<2x1x256xf32> to vector<2x8x256xf32>
    %17 = arith.mulf %15, %16 : vector<2x8x256xf32>
    %18 = arith.addf %11, %17 : vector<2x8x256xf32>
    %19 = vector.extract_strided_slice %1 {offsets = [0, 2], sizes = [8, 1], strides = [1, 1]} : vector<8x4xf32> to vector<8x1xf32>
    %20 = vector.shape_cast %19 : vector<8x1xf32> to vector<1x8x1xf32>
    %21 = vector.extract_strided_slice %0 {offsets = [0, 2, 0], sizes = [2, 1, 256], strides = [1, 1, 1]} : vector<2x4x256xf32> to vector<2x1x256xf32>
    %22 = vector.broadcast %20 : vector<1x8x1xf32> to vector<2x8x256xf32>
    %23 = vector.broadcast %21 : vector<2x1x256xf32> to vector<2x8x256xf32>
    %24 = arith.mulf %22, %23 : vector<2x8x256xf32>
    %25 = arith.addf %18, %24 : vector<2x8x256xf32>
    %26 = vector.extract_strided_slice %1 {offsets = [0, 3], sizes = [8, 1], strides = [1, 1]} : vector<8x4xf32> to vector<8x1xf32>
    %27 = vector.shape_cast %26 : vector<8x1xf32> to vector<1x8x1xf32>
    %28 = vector.extract_strided_slice %0 {offsets = [0, 3, 0], sizes = [2, 1, 256], strides = [1, 1, 1]} : vector<2x4x256xf32> to vector<2x1x256xf32>
    %29 = vector.broadcast %27 : vector<1x8x1xf32> to vector<2x8x256xf32>
    %30 = vector.broadcast %28 : vector<2x1x256xf32> to vector<2x8x256xf32>
    %31 = arith.mulf %29, %30 : vector<2x8x256xf32>
    %32 = arith.addf %25, %31 : vector<2x8x256xf32>
    %cst = arith.constant 0.000000e+00 : f32
    %33 = vector.broadcast %cst : f32 to vector<2x8x256xf32>
    %34 = arith.maximumf %32, %33 : vector<2x8x256xf32>
    %c0_6 = arith.constant 0 : index
    %c0_7 = arith.constant 0 : index
    %c0_8 = arith.constant 0 : index
    %35 = vector.load %arg5[%c0_6, %c0_7, %c0_8] : memref<2x8x256xf32, #tpu.memory_space<vmem>>, vector<2x8x256xf32>
    tpu.vector_store %arg5[%c0_6, %c0_7, %c0_8], %34 {strides = array<i32>} : memref<2x8x256xf32, #tpu.memory_space<vmem>>, vector<2x8x256xf32>,
    return
  }
  func.func @transform_0(%arg0: i32, %arg1: i32) -> (i32, i32, i32) {
    %c0_i32 = arith.constant 0 : i32
    %c0_i32_0 = arith.constant 0 : i32
    return %arg0, %c0_i32, %arg1 : i32, i32, i32
  }
  func.func @transform_1(%arg0: i32, %arg1: i32) -> (i32, i32) {
    %c0_i32 = arith.constant 0 : i32
    %c0_i32_0 = arith.constant 0 : i32
    %c0_i32_1 = arith.constant 0 : i32
    return %c0_i32, %c0_i32_0 : i32, i32
  }
  func.func @transform_2(%arg0: i32, %arg1: i32) -> (i32, i32) {
    %c0_i32 = arith.constant 0 : i32
    %c0_i32_0 = arith.constant 0 : i32
    %c0_i32_1 = arith.constant 0 : i32
    return %c0_i32, %c0_i32_0 : i32, i32
  }
  func.func @transform_3(%arg0: i32, %arg1: i32) -> (i32, i32, i32) {
    %c0_i32 = arith.constant 0 : i32
    %c0_i32_0 = arith.constant 0 : i32
    return %arg0, %c0_i32, %arg1 : i32, i32, i32
  }
}

</mosaic_0001>

<bundles_post_ra>
// kernel: tpu_custom_call.1
= control target key start
LH: loop header
LB: loop body
LE: loop exit
PB: predicated region body
PF: predicated region fallthrough
CT: control target
= control target key end

     0   :  { %v278_v1 = vmov 0   ;;  %v279_v2 = vmov 1   ;;  %s337_s0 = inlined_call_operand.vmem [shape: f32[2,4,256], index: 0, kind: input, shape index: {}]   ;;  %s338_s1 = inlined_call_operand.vmem [shape: f32[8,4], index: 1, kind: input, shape index: {}]   ;;  %s339_s2 = inlined_call_operand.vmem [shape: f32[8,1], index: 2, kind: input, shape index: {}]   ;;  %s340_s3 = inlined_call_operand.hbm [shape: f32[2,8,256], index: 3, kind: output, shape index: {}]  }
   0x1   :  { %v17_v0 = vld [vmem:[%s338_s1] sm:$0xff]  ;;  %250 = vset.pattern.permute.xlu0 %v278_v1  ;;  %251 = vset.pattern.permute.xlu1 %v279_v2 }
   0x2   :  { %8 = vsyncpa [#allocation3], 0  ;;  %21 = vperm.xlu0 %250, %v17_v0   ;;  %76 = vperm.xlu1 %251, %v17_v0   ;;  %v18_v3 = vld [vmem:[%s339_s2] sm:$0xff]  ;;  %v280_v4 = vmov 2   ;;  %v281_v5 = vmov 3   ;;  %v26_v6 = vlaneseq  ;;  %v16_v11 = vld [vmem:[%s337_s0 + $0x8] sm:$0xff] }
   0x3   :  { %v15_v10 = vld [vmem:[%s337_s0] sm:$0xff]  ;;  %s282_s0 = smov [#allocation2]  }
   0x4   :  { %v27_v7 = vshrl.u32 %v26_v6, 7  ;;  %s232_s2 = sshll.u32 %s282_s0, 4  ;;  %s233_s2 = int_to_ptr.vmem [resolvable:$true] %s232_s2 }
   0x5   :  { %s254_s19 = scalar_lea.vmem %s233_s2, 512  ;;  %p259_p1 = scmp.lt.s32.totalorder %s233_s2, %s233_s2 }
   0x6   :  { %68 = vperm.xlu0 %250, %v18_v3   ;;  %252 = vset.pattern.permute.xlu1 %v280_v4  ;;  %v28_v8 = vsub.s32 0, %v27_v7  ;;  %v32_v9 = vsub.s32 4, %v27_v7  ;;  %v81_v12 = vsub.s32 1, %v27_v7  ;;  %v85_v13 = vsub.s32 5, %v27_v7  ;;  %p255_p0 = scmp.ne.s32.totalorder %s233_s2, %s254_s19  ;;  %p260_p2 = scmp.lt.s32.totalorder %s254_s19, %s254_s19 }
   0x7   :  { %124 = vperm.xlu1 %252, %v17_v0   ;;  %v129_v14 = vsub.s32 2, %v27_v7  ;;  %v133_v15 = vsub.s32 6, %v27_v7  ;;  %v317_v16 = vsub.s32 3, %v27_v7  ;;  %v181_v17 = vsub.s32 7, %v27_v7 }
   0x8   :  { %v29_v18 = vrot.slane %v15_v10, %v28_v8  ;;  %v33_v19 = vrot.slane %v15_v10, %v32_v9  ;;  %v37_v20 = vrot.slane %v16_v11, %v28_v8  ;;  %v41_v21 = vrot.slane %v16_v11, %v32_v9  ;;  %p261_p3 = por %p260_p2, %p259_p1 }
   0x9   :  { %v82_v22 = vrot.slane %v15_v10, %v81_v12  ;;  %v86_v23 = vrot.slane %v15_v10, %v85_v13  ;;  %v90_v24 = vrot.slane %v16_v11, %v81_v12  ;;  %v94_v25 = vrot.slane %v16_v11, %v85_v13 }
   0xa   :  { %253 = vset.pattern.permute.xlu0 %v281_v5  ;;  %v130_v26 = vrot.slane %v15_v10, %v129_v14  ;;  %v134_v27 = vrot.slane %v15_v10, %v133_v15  ;;  %v138_v28 = vrot.slane %v16_v11, %v129_v14  ;;  %v142_v29 = vrot.slane %v16_v11, %v133_v15  ;;  %p262_p4 = pnand %p261_p3, %p255_p0 }
   0xb   :  { %172 = vperm.xlu0 %253, %v17_v0   ;;  %v178_v30 = vrot.slane %v15_v10, %v317_v16  ;;  %v182_v31 = vrot.slane %v15_v10, %v181_v17  ;;  %v186_v32 = vrot.slane %v16_v11, %v317_v16  ;;  %v190_v33 = vrot.slane %v16_v11, %v181_v17 }
   0xc   :  { %v49_v34 = vrot.slane %v29_v18, %v28_v8  ;;  %v53_v35 = vrot.slane %v33_v19, %v28_v8  ;;  %v57_v36 = vrot.slane %v37_v20, %v28_v8  ;;  %v61_v37 = vrot.slane %v41_v21, %v28_v8 }
   0xd   :  { %v102_v40 = vrot.slane %v82_v22, %v81_v12  ;;  %v106_v41 = vrot.slane %v86_v23, %v81_v12  ;;  %v110_v42 = vrot.slane %v90_v24, %v81_v12  ;;  %v114_v43 = vrot.slane %v94_v25, %v81_v12 }
   0xe   :  { %v150_v44 = vrot.slane %v130_v26, %v129_v14  ;;  %v154_v45 = vrot.slane %v134_v27, %v129_v14  ;;  %v158_v46 = vrot.slane %v138_v28, %v129_v14  ;;  %v162_v47 = vrot.slane %v142_v29, %v129_v14 }
   0xf   :  { %v198_v48 = vrot.slane %v178_v30, %v317_v16  ;;  %v202_v49 = vrot.slane %v182_v31, %v317_v16  ;;  %v206_v50 = vrot.slane %v186_v32, %v317_v16  ;;  %v210_v51 = vrot.slane %v190_v33, %v317_v16 }
  0x81   :  { %v22_v38 = vpop.permute.xlu0 %21  ;;  %v77_v39 = vpop.permute.xlu1 %76 }
  0x82   :  { %v62_v52 = vmul.f32 %v49_v34, %v22_v38  ;;  %v63_v53 = vmul.f32 %v53_v35, %v22_v38  ;;  %v64_v54 = vmul.f32 %v57_v36, %v22_v38  ;;  %v65_v55 = vmul.f32 %v61_v37, %v22_v38 }
  0x83   :  { %v115_v56 = vmul.f32 %v102_v40, %v77_v39  ;;  %v116_v57 = vmul.f32 %v106_v41, %v77_v39  ;;  %v117_v58 = vmul.f32 %v110_v42, %v77_v39  ;;  %v118_v59 = vmul.f32 %v114_v43, %v77_v39 }
  0x85   :  { %v69_v60 = vpop.permute.xlu0 %68 }
  0x86   :  { %v71_v61 = vadd.f32 %v69_v60, %v62_v52  ;;  %v72_v62 = vadd.f32 %v69_v60, %v63_v53  ;;  %v73_v63 = vadd.f32 %v69_v60, %v64_v54  ;;  %v74_v0 = vadd.f32 %v69_v60, %v65_v55  ;;  %v125_v1 = vpop.permute.xlu1 %124 }
  0x87   :  { %v163_v2 = vmul.f32 %v150_v44, %v125_v1  ;;  %v164_v3 = vmul.f32 %v154_v45, %v125_v1  ;;  %v165_v4 = vmul.f32 %v158_v46, %v125_v1  ;;  %v166_v5 = vmul.f32 %v162_v47, %v125_v1 }
  0x88   :  { %v119_v6 = vadd.f32 %v115_v56, %v71_v61  ;;  %v120_v7 = vadd.f32 %v116_v57, %v72_v62  ;;  %v121_v8 = vadd.f32 %v117_v58, %v73_v63  ;;  %v122_v9 = vadd.f32 %v118_v59, %v74_v0 }
  0x8a   :  { %v167_v10 = vadd.f32 %v163_v2, %v119_v6  ;;  %v168_v11 = vadd.f32 %v164_v3, %v120_v7  ;;  %v169_v12 = vadd.f32 %v165_v4, %v121_v8  ;;  %v170_v13 = vadd.f32 %v166_v5, %v122_v9  ;;  %v173_v14 = vpop.permute.xlu0 %172 }
  0x8b   :  { %v211_v15 = vmul.f32 %v198_v48, %v173_v14  ;;  %v212_v16 = vmul.f32 %v202_v49, %v173_v14  ;;  %v213_v17 = vmul.f32 %v206_v50, %v173_v14  ;;  %v214_v18 = vmul.f32 %v210_v51, %v173_v14 }
  0x8d   :  { %v215_v19 = vadd.f32 %v211_v15, %v167_v10  ;;  %v216_v20 = vadd.f32 %v212_v16, %v168_v11  ;;  %v217_v21 = vadd.f32 %v213_v17, %v169_v12  ;;  %v218_v22 = vadd.f32 %v214_v18, %v170_v13 }
  0x8f   :  { %v219_v23 = vmax.f32 %v215_v19, 0.0  ;;  %v220_v24 = vmax.f32 %v216_v20, 0.0  ;;  %v221_v25 = vmax.f32 %v217_v21, 0.0  ;;  %v222_v26 = vmax.f32 %v218_v22, 0.0 }
  0x91   :  { %223 = vst [vmem:[#allocation2] sm:$0xff] %v219_v23  ;;  %224 = vst [vmem:[#allocation2 + $0x8] sm:$0xff] %v220_v24 }
  0x92   :  { %225 = vst [vmem:[#allocation2 + $0x10] sm:$0xff] %v221_v25  ;;  %226 = vst [vmem:[#allocation2 + $0x18] sm:$0xff] %v222_v26 }
  0x93   :  { %265 = shalt.err (!%p262_p4)
}
  0x94   :  { %s266_s22 = scalar_lea.hbm %s340_s3, 512 }
  0x95   :  { %p267_p5 = scmp.ne.s32.totalorder %s340_s3, %s266_s22  ;;  %p270_p6 = scmp.lt.u32.totalorder %s266_s22, %s340_s3 }
  0x97   :  { %p272_p7 = pnand %p270_p6, %p267_p5 }
  0x99   :  { %275 = shalt.err (!%p272_p7)
}
  0x9a   :  { %s283_s27 = smov 256   ;;  %s284_s28 = smov 16  }
  0x9b   :  { %238 = dma.vmem_to_hbm [thread:$0]  %s233_s2, 512, %s340_s3, [#allocation3], %s283_s27, %s283_s27, %s284_s28  }
  0x9c   :  { %276 = dma.done.wait [#allocation3], 512  }
  0x9d   :  { %277 = vsyncadd [#allocation3], 4294966784 }
  0x9e   :  { %242 = vsyncpa [#allocation3], 1 }

</bundles_post_ra>
